<compile_context>
chip_gen: v5e
topology: v5e:2x2
jax: 0.10.0
libtpu: 0.0.40
codegen_flags: <defaults>
</compile_context>

<pallas_src>
import math

import jax
import jax.numpy as jnp
from jax.experimental import pallas as pl
from jax.experimental.pallas import tpu as pltpu

CHANNELS = 128
PERCENT_ON = 0.15
K_WINNERS = int(round(CHANNELS * PERCENT_ON))  # 19

IN_FEATURES = 7 * 7          # 49
HIDDEN1 = 25
PAD = 128                    # lane-dense padded feature width
_DEFAULT_TB = 256            # max batch-tile rows (keeps the k-WTA tile in vregs)


def _round_up(n, m):
    return ((n + m - 1) // m) * m


def _choose_tiling(batch):
    """Pick (tile_rows, n_blocks).

    Targets an even number (>=2) of grid steps for batch > 8 so both v7x
    TensorCores are busy under dimension_semantics=("parallel",) while keeping
    batch padding minimal; tiles are capped at _DEFAULT_TB rows and rounded up
    to the 8-row sublane granularity.
    """
    if batch <= 8:
        return 8, 1
    n_blocks = 2 * max(1, math.ceil(batch / (2 * _DEFAULT_TB)))
    tb = _round_up(math.ceil(batch / n_blocks), 8)
    return tb, n_blocks


def _autoencoder_kernel(x_ref, w1_ref, b1_ref, w2_ref, b2_ref, w3_ref, b3_ref,
                        out_ref):
    x = x_ref[...]                                                   # (TB, 128)

    # --- encode (padded 128-wide MXU matmuls; padding rows/cols are zero) ---
    h1 = jnp.dot(x, w1_ref[...], preferred_element_type=jnp.float32) + b1_ref[...]
    h1 = jnp.maximum(h1, 0.0)                                        # (TB, 128)

    h2 = jnp.dot(h1, w2_ref[...], preferred_element_type=jnp.float32) + b2_ref[...]
    h2 = jnp.maximum(h2, 0.0)                                        # (TB, 128)

    # --- k-WTA across the 128 channels (KWinners2d, local=True, H=W=1) ---
    # Exact per-row k-th-largest via MSB-first radix selection on the float
    # bit patterns.  h2 >= 0 after ReLU, so the int32 bit pattern is monotone
    # in the float value and bit 31 is always 0 -> 31 iterations.  Per
    # iteration: one broadcast-compare over the (TB,128) tile (VPU) and one
    # lane reduction (XLU).  `prefix` converges to the bit pattern of the
    # k-th-largest value of each row (largest t with #{u >= t} >= K).
    u = pltpu.bitcast(h2, jnp.int32)                                 # (TB, 128)
    prefix = jnp.zeros((u.shape[0], 1), jnp.int32)
    for bit in range(30, -1, -1):
        cand = prefix | (1 << bit)                                   # (TB, 1)
        cnt = jnp.sum((u >= cand).astype(jnp.float32), axis=-1, keepdims=True)
        prefix = jnp.where(cnt >= float(K_WINNERS), cand, prefix)
    kw = jnp.where(u >= prefix, h2, 0.0)                             # (TB, 128)

    # --- decode ---
    logits = jnp.dot(kw, w3_ref[...], preferred_element_type=jnp.float32) + b3_ref[...]
    e = jnp.exp(-logits)                                             # EUP
    out_ref[...] = pl.reciprocal(1.0 + e, approx=True)               # EUP recip


def init_params(key):
    """Deterministic synthetic init mimicking nn.Linear (uniform +-1/sqrt(fan_in)).
    Weights are stored transposed as (in_features, out_features)."""
    def linear(k, fan_in, fan_out):
        kw, kb = jax.random.split(k)
        bound = 1.0 / jnp.sqrt(float(fan_in))
        w = jax.random.uniform(kw, (fan_in, fan_out), jnp.float32, -bound, bound)
        b = jax.random.uniform(kb, (1, fan_out), jnp.float32, -bound, bound)
        return w, b

    k1, k2, k3 = jax.random.split(key, 3)
    w1, b1 = linear(k1, IN_FEATURES, HIDDEN1)
    w2, b2 = linear(k2, HIDDEN1, CHANNELS)
    w3, b3 = linear(k3, CHANNELS, IN_FEATURES)
    return w1, b1, w2, b2, w3, b3


def _pad2(a, rows, cols):
    return jnp.pad(a, ((0, rows - a.shape[0]), (0, cols - a.shape[1])))


@jax.jit
def mlp_autoencoder_forward(x, w1, b1, w2, b2, w3, b3):
    """x: (B, 7, 7) float32 -> (B, 7, 7) float32."""
    b = x.shape[0]

    tb, n_blocks = _choose_tiling(b)
    b_pad = tb * n_blocks

    x2 = x.reshape(b, IN_FEATURES).astype(jnp.float32)
    x_p = jnp.pad(x2, ((0, b_pad - b), (0, PAD - IN_FEATURES)))       # (b_pad, 128)

    # Zero-pad weights/biases to lane-dense 128-wide tiles.
    w1p = _pad2(w1.astype(jnp.float32), PAD, PAD)                     # (128, 128)
    b1p = _pad2(b1.astype(jnp.float32), 1, PAD)                       # (1, 128)
    w2p = _pad2(w2.astype(jnp.float32), PAD, PAD)
    b2p = _pad2(b2.astype(jnp.float32), 1, PAD)
    w3p = _pad2(w3.astype(jnp.float32), PAD, PAD)
    b3p = _pad2(b3.astype(jnp.float32), 1, PAD)

    flops = 2 * b_pad * PAD * PAD * 3 + 31 * 3 * b_pad * PAD
    bytes_accessed = (2 * b_pad * PAD * 4          # x in, out
                      + 3 * PAD * PAD * 4          # weights
                      + 3 * PAD * 4)               # biases

    out = pl.pallas_call(
        _autoencoder_kernel,
        out_shape=jax.ShapeDtypeStruct((b_pad, PAD), jnp.float32),
        grid=(n_blocks,),
        in_specs=[
            pl.BlockSpec((tb, PAD), lambda i: (i, 0)),     # x tile
            pl.BlockSpec((PAD, PAD), lambda i: (0, 0)),    # W1 (resident)
            pl.BlockSpec((1, PAD), lambda i: (0, 0)),      # b1
            pl.BlockSpec((PAD, PAD), lambda i: (0, 0)),    # W2
            pl.BlockSpec((1, PAD), lambda i: (0, 0)),      # b2
            pl.BlockSpec((PAD, PAD), lambda i: (0, 0)),    # W3
            pl.BlockSpec((1, PAD), lambda i: (0, 0)),      # b3
        ],
        out_specs=pl.BlockSpec((tb, PAD), lambda i: (i, 0)),
        compiler_params=pltpu.CompilerParams(
            dimension_semantics=("parallel",),
            vmem_limit_bytes=32 * 1024 * 1024,
        ),
        cost_estimate=pl.CostEstimate(
            flops=flops,
            transcendentals=b_pad * PAD,
            bytes_accessed=bytes_accessed,
        ),
    )(x_p, w1p, b1p, w2p, b2p, w3p, b3p)

    return out[:b, :IN_FEATURES].reshape(b, 7, 7)


def _reference_forward(x, w1, b1, w2, b2, w3, b3):
    """Plain-JAX reference (same math) for a sanity check."""
    b = x.shape[0]
    hp = jax.lax.Precision.HIGHEST
    x2 = x.reshape(b, IN_FEATURES)
    h1 = jnp.maximum(jnp.dot(x2, w1, precision=hp) + b1, 0.0)
    h2 = jnp.maximum(jnp.dot(h1, w2, precision=hp) + b2, 0.0)
    thresh = jnp.sort(h2, axis=-1)[:, CHANNELS - K_WINNERS][:, None]
    kw = jnp.where(h2 >= thresh, h2, 0.0)
    return jax.nn.sigmoid(jnp.dot(kw, w3, precision=hp) + b3).reshape(b, 7, 7)


if __name__ == "__main__":
    key = jax.random.PRNGKey(0)
    k_params, k_x1, k_x2 = jax.random.split(key, 3)
    params = init_params(k_params)

    # Small demo batch (single grid step).
    B = 8
    x = jax.random.uniform(k_x1, (B, 7, 7), jnp.float32)   # pixel patches in [0,1)
    out = jax.block_until_ready(mlp_autoencoder_forward(x, *params))
    assert out.shape == (B, 7, 7), out.shape
    assert bool(jnp.all(jnp.isfinite(out)))
    ref = _reference_forward(x, *params)
    assert bool(jnp.allclose(out, ref, atol=2e-3, rtol=2e-3)), "mismatch (B=8)"

    # Exercise batch padding + multi-step parallel grid (300 -> 2 tiles of 152).
    B2 = 300
    x2 = jax.random.uniform(k_x2, (B2, 7, 7), jnp.float32)
    out2 = jax.block_until_ready(mlp_autoencoder_forward(x2, *params))
    ref2 = _reference_forward(x2, *params)
    assert out2.shape == (B2, 7, 7)
    assert bool(jnp.allclose(out2, ref2, atol=2e-3, rtol=2e-3)), "mismatch (B=300)"

    print("KERNEL_OK")
</pallas_src>

<mosaic_0001>
module attributes {stable_mosaic.version = 11 : i64} {
  func.func @_autoencoder_kernel(%arg0: i32, %arg1: memref<8x128xf32, #tpu.memory_space<vmem>>, %arg2: memref<128x128xf32, #tpu.memory_space<vmem>>, %arg3: memref<1x128xf32, #tpu.memory_space<vmem>>, %arg4: memref<128x128xf32, #tpu.memory_space<vmem>>, %arg5: memref<1x128xf32, #tpu.memory_space<vmem>>, %arg6: memref<128x128xf32, #tpu.memory_space<vmem>>, %arg7: memref<1x128xf32, #tpu.memory_space<vmem>>, %arg8: memref<8x128xf32, #tpu.memory_space<vmem>>) attributes {dimension_semantics = [#tpu.dimension_semantics<parallel>], iteration_bounds = array<i64: 1>, scalar_prefetch = 0 : i64, scratch_operands = 0 : i64, tpu.core_type = #tpu.core_type<tc>, window_params = [{transform_indices = @transform_0, window_bounds = array<i64: 8, 128>}, {pipeline_mode = #tpu.pipeline_mode<synchronous>, transform_indices = @transform_1, window_bounds = array<i64: 128, 128>}, {pipeline_mode = #tpu.pipeline_mode<synchronous>, transform_indices = @transform_2, window_bounds = array<i64: 1, 128>}, {pipeline_mode = #tpu.pipeline_mode<synchronous>, transform_indices = @transform_3, window_bounds = array<i64: 128, 128>}, {pipeline_mode = #tpu.pipeline_mode<synchronous>, transform_indices = @transform_4, window_bounds = array<i64: 1, 128>}, {pipeline_mode = #tpu.pipeline_mode<synchronous>, transform_indices = @transform_5, window_bounds = array<i64: 128, 128>}, {pipeline_mode = #tpu.pipeline_mode<synchronous>, transform_indices = @transform_6, window_bounds = array<i64: 1, 128>}, {transform_indices = @transform_7, window_bounds = array<i64: 8, 128>}]} {
    %c0 = arith.constant 0 : index
    %c0_0 = arith.constant 0 : index
    %0 = vector.load %arg1[%c0, %c0_0] : memref<8x128xf32, #tpu.memory_space<vmem>>, vector<8x128xf32>
    %c0_1 = arith.constant 0 : index
    %c0_2 = arith.constant 0 : index
    %1 = vector.load %arg2[%c0_1, %c0_2] : memref<128x128xf32, #tpu.memory_space<vmem>>, vector<128x128xf32>
    %cst = arith.constant dense<0.000000e+00> : vector<8x128xf32>
    %2 = tpu.matmul %0, %1, %cst {dimension_numbers = #tpu.dot_dimension_numbers<[1], [0], [0], [1], [0, 0, 1, 1], [], []>} : vector<8x128xf32>, vector<128x128xf32>, vector<8x128xf32> -> vector<8x128xf32>
    %c0_3 = arith.constant 0 : index
    %c0_4 = arith.constant 0 : index
    %3 = vector.load %arg3[%c0_3, %c0_4] : memref<1x128xf32, #tpu.memory_space<vmem>>, vector<1x128xf32>
    %4 = vector.broadcast %3 : vector<1x128xf32> to vector<8x128xf32>
    %5 = arith.addf %2, %4 : vector<8x128xf32>
    %cst_5 = arith.constant 0.000000e+00 : f32
    %6 = vector.broadcast %cst_5 : f32 to vector<8x128xf32>
    %7 = arith.maximumf %5, %6 : vector<8x128xf32>
    %c0_6 = arith.constant 0 : index
    %c0_7 = arith.constant 0 : index
    %8 = vector.load %arg4[%c0_6, %c0_7] : memref<128x128xf32, #tpu.memory_space<vmem>>, vector<128x128xf32>
    %cst_8 = arith.constant dense<0.000000e+00> : vector<8x128xf32>
    %9 = tpu.matmul %7, %8, %cst_8 {dimension_numbers = #tpu.dot_dimension_numbers<[1], [0], [0], [1], [0, 0, 1, 1], [], []>} : vector<8x128xf32>, vector<128x128xf32>, vector<8x128xf32> -> vector<8x128xf32>
    %c0_9 = arith.constant 0 : index
    %c0_10 = arith.constant 0 : index
    %10 = vector.load %arg5[%c0_9, %c0_10] : memref<1x128xf32, #tpu.memory_space<vmem>>, vector<1x128xf32>
    %11 = vector.broadcast %10 : vector<1x128xf32> to vector<8x128xf32>
    %12 = arith.addf %9, %11 : vector<8x128xf32>
    %cst_11 = arith.constant 0.000000e+00 : f32
    %13 = vector.broadcast %cst_11 : f32 to vector<8x128xf32>
    %14 = arith.maximumf %12, %13 : vector<8x128xf32>
    %15 = tpu.bitcast %14 : vector<8x128xf32> -> vector<8x128xi32>
    %c0_i32 = arith.constant 0 : i32
    %16 = vector.broadcast %c0_i32 : i32 to vector<8x1xi32>
    %c1073741824_i32 = arith.constant 1073741824 : i32
    %17 = vector.broadcast %c1073741824_i32 : i32 to vector<8x1xi32>
    %18 = arith.ori %16, %17 : vector<8x1xi32>
    %19 = vector.broadcast %18 : vector<8x1xi32> to vector<8x128xi32>
    %20 = arith.cmpi sge, %15, %19 : vector<8x128xi32>
    %21 = arith.extui %20 : vector<8x128xi1> to vector<8x128xi32>
    %22 = arith.sitofp %21 : vector<8x128xi32> to vector<8x128xf32>
    %cst_12 = arith.constant dense<0.000000e+00> : vector<8xf32>
    %23 = vector.multi_reduction <add>, %22, %cst_12 [1] : vector<8x128xf32> to vector<8xf32>
    %24 = vector.shape_cast %23 : vector<8xf32> to vector<8x1xf32>
    %cst_13 = arith.constant 1.900000e+01 : f32
    %25 = vector.broadcast %cst_13 : f32 to vector<8x1xf32>
    %26 = arith.cmpf oge, %24, %25 : vector<8x1xf32>
    %27 = arith.select %26, %18, %16 : vector<8x1xi1>, vector<8x1xi32>
    %c536870912_i32 = arith.constant 536870912 : i32
    %28 = vector.broadcast %c536870912_i32 : i32 to vector<8x1xi32>
    %29 = arith.ori %27, %28 : vector<8x1xi32>
    %30 = vector.broadcast %29 : vector<8x1xi32> to vector<8x128xi32>
    %31 = arith.cmpi sge, %15, %30 : vector<8x128xi32>
    %32 = arith.extui %31 : vector<8x128xi1> to vector<8x128xi32>
    %33 = arith.sitofp %32 : vector<8x128xi32> to vector<8x128xf32>
    %cst_14 = arith.constant dense<0.000000e+00> : vector<8xf32>
    %34 = vector.multi_reduction <add>, %33, %cst_14 [1] : vector<8x128xf32> to vector<8xf32>
    %35 = vector.shape_cast %34 : vector<8xf32> to vector<8x1xf32>
    %cst_15 = arith.constant 1.900000e+01 : f32
    %36 = vector.broadcast %cst_15 : f32 to vector<8x1xf32>
    %37 = arith.cmpf oge, %35, %36 : vector<8x1xf32>
    %38 = arith.select %37, %29, %27 : vector<8x1xi1>, vector<8x1xi32>
    %c268435456_i32 = arith.constant 268435456 : i32
    %39 = vector.broadcast %c268435456_i32 : i32 to vector<8x1xi32>
    %40 = arith.ori %38, %39 : vector<8x1xi32>
    %41 = vector.broadcast %40 : vector<8x1xi32> to vector<8x128xi32>
    %42 = arith.cmpi sge, %15, %41 : vector<8x128xi32>
    %43 = arith.extui %42 : vector<8x128xi1> to vector<8x128xi32>
    %44 = arith.sitofp %43 : vector<8x128xi32> to vector<8x128xf32>
    %cst_16 = arith.constant dense<0.000000e+00> : vector<8xf32>
    %45 = vector.multi_reduction <add>, %44, %cst_16 [1] : vector<8x128xf32> to vector<8xf32>
    %46 = vector.shape_cast %45 : vector<8xf32> to vector<8x1xf32>
    %cst_17 = arith.constant 1.900000e+01 : f32
    %47 = vector.broadcast %cst_17 : f32 to vector<8x1xf32>
    %48 = arith.cmpf oge, %46, %47 : vector<8x1xf32>
    %49 = arith.select %48, %40, %38 : vector<8x1xi1>, vector<8x1xi32>
    %c134217728_i32 = arith.constant 134217728 : i32
    %50 = vector.broadcast %c134217728_i32 : i32 to vector<8x1xi32>
    %51 = arith.ori %49, %50 : vector<8x1xi32>
    %52 = vector.broadcast %51 : vector<8x1xi32> to vector<8x128xi32>
    %53 = arith.cmpi sge, %15, %52 : vector<8x128xi32>
    %54 = arith.extui %53 : vector<8x128xi1> to vector<8x128xi32>
    %55 = arith.sitofp %54 : vector<8x128xi32> to vector<8x128xf32>
    %cst_18 = arith.constant dense<0.000000e+00> : vector<8xf32>
    %56 = vector.multi_reduction <add>, %55, %cst_18 [1] : vector<8x128xf32> to vector<8xf32>
    %57 = vector.shape_cast %56 : vector<8xf32> to vector<8x1xf32>
    %cst_19 = arith.constant 1.900000e+01 : f32
    %58 = vector.broadcast %cst_19 : f32 to vector<8x1xf32>
    %59 = arith.cmpf oge, %57, %58 : vector<8x1xf32>
    %60 = arith.select %59, %51, %49 : vector<8x1xi1>, vector<8x1xi32>
    %c67108864_i32 = arith.constant 67108864 : i32
    %61 = vector.broadcast %c67108864_i32 : i32 to vector<8x1xi32>
    %62 = arith.ori %60, %61 : vector<8x1xi32>
    %63 = vector.broadcast %62 : vector<8x1xi32> to vector<8x128xi32>
    %64 = arith.cmpi sge, %15, %63 : vector<8x128xi32>
    %65 = arith.extui %64 : vector<8x128xi1> to vector<8x128xi32>
    %66 = arith.sitofp %65 : vector<8x128xi32> to vector<8x128xf32>
    %cst_20 = arith.constant dense<0.000000e+00> : vector<8xf32>
    %67 = vector.multi_reduction <add>, %66, %cst_20 [1] : vector<8x128xf32> to vector<8xf32>
    %68 = vector.shape_cast %67 : vector<8xf32> to vector<8x1xf32>
    %cst_21 = arith.constant 1.900000e+01 : f32
    %69 = vector.broadcast %cst_21 : f32 to vector<8x1xf32>
    %70 = arith.cmpf oge, %68, %69 : vector<8x1xf32>
    %71 = arith.select %70, %62, %60 : vector<8x1xi1>, vector<8x1xi32>
    %c33554432_i32 = arith.constant 33554432 : i32
    %72 = vector.broadcast %c33554432_i32 : i32 to vector<8x1xi32>
    %73 = arith.ori %71, %72 : vector<8x1xi32>
    %74 = vector.broadcast %73 : vector<8x1xi32> to vector<8x128xi32>
    %75 = arith.cmpi sge, %15, %74 : vector<8x128xi32>
    %76 = arith.extui %75 : vector<8x128xi1> to vector<8x128xi32>
    %77 = arith.sitofp %76 : vector<8x128xi32> to vector<8x128xf32>
    %cst_22 = arith.constant dense<0.000000e+00> : vector<8xf32>
    %78 = vector.multi_reduction <add>, %77, %cst_22 [1] : vector<8x128xf32> to vector<8xf32>
    %79 = vector.shape_cast %78 : vector<8xf32> to vector<8x1xf32>
    %cst_23 = arith.constant 1.900000e+01 : f32
    %80 = vector.broadcast %cst_23 : f32 to vector<8x1xf32>
    %81 = arith.cmpf oge, %79, %80 : vector<8x1xf32>
    %82 = arith.select %81, %73, %71 : vector<8x1xi1>, vector<8x1xi32>
    %c16777216_i32 = arith.constant 16777216 : i32
    %83 = vector.broadcast %c16777216_i32 : i32 to vector<8x1xi32>
    %84 = arith.ori %82, %83 : vector<8x1xi32>
    %85 = vector.broadcast %84 : vector<8x1xi32> to vector<8x128xi32>
    %86 = arith.cmpi sge, %15, %85 : vector<8x128xi32>
    %87 = arith.extui %86 : vector<8x128xi1> to vector<8x128xi32>
    %88 = arith.sitofp %87 : vector<8x128xi32> to vector<8x128xf32>
    %cst_24 = arith.constant dense<0.000000e+00> : vector<8xf32>
    %89 = vector.multi_reduction <add>, %88, %cst_24 [1] : vector<8x128xf32> to vector<8xf32>
    %90 = vector.shape_cast %89 : vector<8xf32> to vector<8x1xf32>
    %cst_25 = arith.constant 1.900000e+01 : f32
    %91 = vector.broadcast %cst_25 : f32 to vector<8x1xf32>
    %92 = arith.cmpf oge, %90, %91 : vector<8x1xf32>
    %93 = arith.select %92, %84, %82 : vector<8x1xi1>, vector<8x1xi32>
    %c8388608_i32 = arith.constant 8388608 : i32
    %94 = vector.broadcast %c8388608_i32 : i32 to vector<8x1xi32>
    %95 = arith.ori %93, %94 : vector<8x1xi32>
    %96 = vector.broadcast %95 : vector<8x1xi32> to vector<8x128xi32>
    %97 = arith.cmpi sge, %15, %96 : vector<8x128xi32>
    %98 = arith.extui %97 : vector<8x128xi1> to vector<8x128xi32>
    %99 = arith.sitofp %98 : vector<8x128xi32> to vector<8x128xf32>
    %cst_26 = arith.constant dense<0.000000e+00> : vector<8xf32>
    %100 = vector.multi_reduction <add>, %99, %cst_26 [1] : vector<8x128xf32> to vector<8xf32>
    %101 = vector.shape_cast %100 : vector<8xf32> to vector<8x1xf32>
    %cst_27 = arith.constant 1.900000e+01 : f32
    %102 = vector.broadcast %cst_27 : f32 to vector<8x1xf32>
    %103 = arith.cmpf oge, %101, %102 : vector<8x1xf32>
    %104 = arith.select %103, %95, %93 : vector<8x1xi1>, vector<8x1xi32>
    %c4194304_i32 = arith.constant 4194304 : i32
    %105 = vector.broadcast %c4194304_i32 : i32 to vector<8x1xi32>
    %106 = arith.ori %104, %105 : vector<8x1xi32>
    %107 = vector.broadcast %106 : vector<8x1xi32> to vector<8x128xi32>
    %108 = arith.cmpi sge, %15, %107 : vector<8x128xi32>
    %109 = arith.extui %108 : vector<8x128xi1> to vector<8x128xi32>
    %110 = arith.sitofp %109 : vector<8x128xi32> to vector<8x128xf32>
    %cst_28 = arith.constant dense<0.000000e+00> : vector<8xf32>
    %111 = vector.multi_reduction <add>, %110, %cst_28 [1] : vector<8x128xf32> to vector<8xf32>
    %112 = vector.shape_cast %111 : vector<8xf32> to vector<8x1xf32>
    %cst_29 = arith.constant 1.900000e+01 : f32
    %113 = vector.broadcast %cst_29 : f32 to vector<8x1xf32>
    %114 = arith.cmpf oge, %112, %113 : vector<8x1xf32>
    %115 = arith.select %114, %106, %104 : vector<8x1xi1>, vector<8x1xi32>
    %c2097152_i32 = arith.constant 2097152 : i32
    %116 = vector.broadcast %c2097152_i32 : i32 to vector<8x1xi32>
    %117 = arith.ori %115, %116 : vector<8x1xi32>
    %118 = vector.broadcast %117 : vector<8x1xi32> to vector<8x128xi32>
    %119 = arith.cmpi sge, %15, %118 : vector<8x128xi32>
    %120 = arith.extui %119 : vector<8x128xi1> to vector<8x128xi32>
    %121 = arith.sitofp %120 : vector<8x128xi32> to vector<8x128xf32>
    %cst_30 = arith.constant dense<0.000000e+00> : vector<8xf32>
    %122 = vector.multi_reduction <add>, %121, %cst_30 [1] : vector<8x128xf32> to vector<8xf32>
    %123 = vector.shape_cast %122 : vector<8xf32> to vector<8x1xf32>
    %cst_31 = arith.constant 1.900000e+01 : f32
    %124 = vector.broadcast %cst_31 : f32 to vector<8x1xf32>
    %125 = arith.cmpf oge, %123, %124 : vector<8x1xf32>
    %126 = arith.select %125, %117, %115 : vector<8x1xi1>, vector<8x1xi32>
    %c1048576_i32 = arith.constant 1048576 : i32
    %127 = vector.broadcast %c1048576_i32 : i32 to vector<8x1xi32>
    %128 = arith.ori %126, %127 : vector<8x1xi32>
    %129 = vector.broadcast %128 : vector<8x1xi32> to vector<8x128xi32>
    %130 = arith.cmpi sge, %15, %129 : vector<8x128xi32>
    %131 = arith.extui %130 : vector<8x128xi1> to vector<8x128xi32>
    %132 = arith.sitofp %131 : vector<8x128xi32> to vector<8x128xf32>
    %cst_32 = arith.constant dense<0.000000e+00> : vector<8xf32>
    %133 = vector.multi_reduction <add>, %132, %cst_32 [1] : vector<8x128xf32> to vector<8xf32>
    %134 = vector.shape_cast %133 : vector<8xf32> to vector<8x1xf32>
    %cst_33 = arith.constant 1.900000e+01 : f32
    %135 = vector.broadcast %cst_33 : f32 to vector<8x1xf32>
    %136 = arith.cmpf oge, %134, %135 : vector<8x1xf32>
    %137 = arith.select %136, %128, %126 : vector<8x1xi1>, vector<8x1xi32>
    %c524288_i32 = arith.constant 524288 : i32
    %138 = vector.broadcast %c524288_i32 : i32 to vector<8x1xi32>
    %139 = arith.ori %137, %138 : vector<8x1xi32>
    %140 = vector.broadcast %139 : vector<8x1xi32> to vector<8x128xi32>
    %141 = arith.cmpi sge, %15, %140 : vector<8x128xi32>
    %142 = arith.extui %141 : vector<8x128xi1> to vector<8x128xi32>
    %143 = arith.sitofp %142 : vector<8x128xi32> to vector<8x128xf32>
    %cst_34 = arith.constant dense<0.000000e+00> : vector<8xf32>
    %144 = vector.multi_reduction <add>, %143, %cst_34 [1] : vector<8x128xf32> to vector<8xf32>
    %145 = vector.shape_cast %144 : vector<8xf32> to vector<8x1xf32>
    %cst_35 = arith.constant 1.900000e+01 : f32
    %146 = vector.broadcast %cst_35 : f32 to vector<8x1xf32>
    %147 = arith.cmpf oge, %145, %146 : vector<8x1xf32>
    %148 = arith.select %147, %139, %137 : vector<8x1xi1>, vector<8x1xi32>
    %c262144_i32 = arith.constant 262144 : i32
    %149 = vector.broadcast %c262144_i32 : i32 to vector<8x1xi32>
    %150 = arith.ori %148, %149 : vector<8x1xi32>
    %151 = vector.broadcast %150 : vector<8x1xi32> to vector<8x128xi32>
    %152 = arith.cmpi sge, %15, %151 : vector<8x128xi32>
    %153 = arith.extui %152 : vector<8x128xi1> to vector<8x128xi32>
    %154 = arith.sitofp %153 : vector<8x128xi32> to vector<8x128xf32>
    %cst_36 = arith.constant dense<0.000000e+00> : vector<8xf32>
    %155 = vector.multi_reduction <add>, %154, %cst_36 [1] : vector<8x128xf32> to vector<8xf32>
    %156 = vector.shape_cast %155 : vector<8xf32> to vector<8x1xf32>
    %cst_37 = arith.constant 1.900000e+01 : f32
    %157 = vector.broadcast %cst_37 : f32 to vector<8x1xf32>
    %158 = arith.cmpf oge, %156, %157 : vector<8x1xf32>
    %159 = arith.select %158, %150, %148 : vector<8x1xi1>, vector<8x1xi32>
    %c131072_i32 = arith.constant 131072 : i32
    %160 = vector.broadcast %c131072_i32 : i32 to vector<8x1xi32>
    %161 = arith.ori %159, %160 : vector<8x1xi32>
    %162 = vector.broadcast %161 : vector<8x1xi32> to vector<8x128xi32>
    %163 = arith.cmpi sge, %15, %162 : vector<8x128xi32>
    %164 = arith.extui %163 : vector<8x128xi1> to vector<8x128xi32>
    %165 = arith.sitofp %164 : vector<8x128xi32> to vector<8x128xf32>
    %cst_38 = arith.constant dense<0.000000e+00> : vector<8xf32>
    %166 = vector.multi_reduction <add>, %165, %cst_38 [1] : vector<8x128xf32> to vector<8xf32>
    %167 = vector.shape_cast %166 : vector<8xf32> to vector<8x1xf32>
    %cst_39 = arith.constant 1.900000e+01 : f32
    %168 = vector.broadcast %cst_39 : f32 to vector<8x1xf32>
    %169 = arith.cmpf oge, %167, %168 : vector<8x1xf32>
    %170 = arith.select %169, %161, %159 : vector<8x1xi1>, vector<8x1xi32>
    %c65536_i32 = arith.constant 65536 : i32
    %171 = vector.broadcast %c65536_i32 : i32 to vector<8x1xi32>
    %172 = arith.ori %170, %171 : vector<8x1xi32>
    %173 = vector.broadcast %172 : vector<8x1xi32> to vector<8x128xi32>
    %174 = arith.cmpi sge, %15, %173 : vector<8x128xi32>
    %175 = arith.extui %174 : vector<8x128xi1> to vector<8x128xi32>
    %176 = arith.sitofp %175 : vector<8x128xi32> to vector<8x128xf32>
    %cst_40 = arith.constant dense<0.000000e+00> : vector<8xf32>
    %177 = vector.multi_reduction <add>, %176, %cst_40 [1] : vector<8x128xf32> to vector<8xf32>
    %178 = vector.shape_cast %177 : vector<8xf32> to vector<8x1xf32>
    %cst_41 = arith.constant 1.900000e+01 : f32
    %179 = vector.broadcast %cst_41 : f32 to vector<8x1xf32>
    %180 = arith.cmpf oge, %178, %179 : vector<8x1xf32>
    %181 = arith.select %180, %172, %170 : vector<8x1xi1>, vector<8x1xi32>
    %c32768_i32 = arith.constant 32768 : i32
    %182 = vector.broadcast %c32768_i32 : i32 to vector<8x1xi32>
    %183 = arith.ori %181, %182 : vector<8x1xi32>
    %184 = vector.broadcast %183 : vector<8x1xi32> to vector<8x128xi32>
    %185 = arith.cmpi sge, %15, %184 : vector<8x128xi32>
    %186 = arith.extui %185 : vector<8x128xi1> to vector<8x128xi32>
    %187 = arith.sitofp %186 : vector<8x128xi32> to vector<8x128xf32>
    %cst_42 = arith.constant dense<0.000000e+00> : vector<8xf32>
    %188 = vector.multi_reduction <add>, %187, %cst_42 [1] : vector<8x128xf32> to vector<8xf32>
    %189 = vector.shape_cast %188 : vector<8xf32> to vector<8x1xf32>
    %cst_43 = arith.constant 1.900000e+01 : f32
    %190 = vector.broadcast %cst_43 : f32 to vector<8x1xf32>
    %191 = arith.cmpf oge, %189, %190 : vector<8x1xf32>
    %192 = arith.select %191, %183, %181 : vector<8x1xi1>, vector<8x1xi32>
    %c16384_i32 = arith.constant 16384 : i32
    %193 = vector.broadcast %c16384_i32 : i32 to vector<8x1xi32>
    %194 = arith.ori %192, %193 : vector<8x1xi32>
    %195 = vector.broadcast %194 : vector<8x1xi32> to vector<8x128xi32>
    %196 = arith.cmpi sge, %15, %195 : vector<8x128xi32>
    %197 = arith.extui %196 : vector<8x128xi1> to vector<8x128xi32>
    %198 = arith.sitofp %197 : vector<8x128xi32> to vector<8x128xf32>
    %cst_44 = arith.constant dense<0.000000e+00> : vector<8xf32>
    %199 = vector.multi_reduction <add>, %198, %cst_44 [1] : vector<8x128xf32> to vector<8xf32>
    %200 = vector.shape_cast %199 : vector<8xf32> to vector<8x1xf32>
    %cst_45 = arith.constant 1.900000e+01 : f32
    %201 = vector.broadcast %cst_45 : f32 to vector<8x1xf32>
    %202 = arith.cmpf oge, %200, %201 : vector<8x1xf32>
    %203 = arith.select %202, %194, %192 : vector<8x1xi1>, vector<8x1xi32>
    %c8192_i32 = arith.constant 8192 : i32
    %204 = vector.broadcast %c8192_i32 : i32 to vector<8x1xi32>
    %205 = arith.ori %203, %204 : vector<8x1xi32>
    %206 = vector.broadcast %205 : vector<8x1xi32> to vector<8x128xi32>
    %207 = arith.cmpi sge, %15, %206 : vector<8x128xi32>
    %208 = arith.extui %207 : vector<8x128xi1> to vector<8x128xi32>
    %209 = arith.sitofp %208 : vector<8x128xi32> to vector<8x128xf32>
    %cst_46 = arith.constant dense<0.000000e+00> : vector<8xf32>
    %210 = vector.multi_reduction <add>, %209, %cst_46 [1] : vector<8x128xf32> to vector<8xf32>
    %211 = vector.shape_cast %210 : vector<8xf32> to vector<8x1xf32>
    %cst_47 = arith.constant 1.900000e+01 : f32
    %212 = vector.broadcast %cst_47 : f32 to vector<8x1xf32>
    %213 = arith.cmpf oge, %211, %212 : vector<8x1xf32>
    %214 = arith.select %213, %205, %203 : vector<8x1xi1>, vector<8x1xi32>
    %c4096_i32 = arith.constant 4096 : i32
    %215 = vector.broadcast %c4096_i32 : i32 to vector<8x1xi32>
    %216 = arith.ori %214, %215 : vector<8x1xi32>
    %217 = vector.broadcast %216 : vector<8x1xi32> to vector<8x128xi32>
    %218 = arith.cmpi sge, %15, %217 : vector<8x128xi32>
    %219 = arith.extui %218 : vector<8x128xi1> to vector<8x128xi32>
    %220 = arith.sitofp %219 : vector<8x128xi32> to vector<8x128xf32>
    %cst_48 = arith.constant dense<0.000000e+00> : vector<8xf32>
    %221 = vector.multi_reduction <add>, %220, %cst_48 [1] : vector<8x128xf32> to vector<8xf32>
    %222 = vector.shape_cast %221 : vector<8xf32> to vector<8x1xf32>
    %cst_49 = arith.constant 1.900000e+01 : f32
    %223 = vector.broadcast %cst_49 : f32 to vector<8x1xf32>
    %224 = arith.cmpf oge, %222, %223 : vector<8x1xf32>
    %225 = arith.select %224, %216, %214 : vector<8x1xi1>, vector<8x1xi32>
    %c2048_i32 = arith.constant 2048 : i32
    %226 = vector.broadcast %c2048_i32 : i32 to vector<8x1xi32>
    %227 = arith.ori %225, %226 : vector<8x1xi32>
    %228 = vector.broadcast %227 : vector<8x1xi32> to vector<8x128xi32>
    %229 = arith.cmpi sge, %15, %228 : vector<8x128xi32>
    %230 = arith.extui %229 : vector<8x128xi1> to vector<8x128xi32>
    %231 = arith.sitofp %230 : vector<8x128xi32> to vector<8x128xf32>
    %cst_50 = arith.constant dense<0.000000e+00> : vector<8xf32>
    %232 = vector.multi_reduction <add>, %231, %cst_50 [1] : vector<8x128xf32> to vector<8xf32>
    %233 = vector.shape_cast %232 : vector<8xf32> to vector<8x1xf32>
    %cst_51 = arith.constant 1.900000e+01 : f32
    %234 = vector.broadcast %cst_51 : f32 to vector<8x1xf32>
    %235 = arith.cmpf oge, %233, %234 : vector<8x1xf32>
    %236 = arith.select %235, %227, %225 : vector<8x1xi1>, vector<8x1xi32>
    %c1024_i32 = arith.constant 1024 : i32
    %237 = vector.broadcast %c1024_i32 : i32 to vector<8x1xi32>
    %238 = arith.ori %236, %237 : vector<8x1xi32>
    %239 = vector.broadcast %238 : vector<8x1xi32> to vector<8x128xi32>
    %240 = arith.cmpi sge, %15, %239 : vector<8x128xi32>
    %241 = arith.extui %240 : vector<8x128xi1> to vector<8x128xi32>
    %242 = arith.sitofp %241 : vector<8x128xi32> to vector<8x128xf32>
    %cst_52 = arith.constant dense<0.000000e+00> : vector<8xf32>
    %243 = vector.multi_reduction <add>, %242, %cst_52 [1] : vector<8x128xf32> to vector<8xf32>
    %244 = vector.shape_cast %243 : vector<8xf32> to vector<8x1xf32>
    %cst_53 = arith.constant 1.900000e+01 : f32
    %245 = vector.broadcast %cst_53 : f32 to vector<8x1xf32>
    %246 = arith.cmpf oge, %244, %245 : vector<8x1xf32>
    %247 = arith.select %246, %238, %236 : vector<8x1xi1>, vector<8x1xi32>
    %c512_i32 = arith.constant 512 : i32
    %248 = vector.broadcast %c512_i32 : i32 to vector<8x1xi32>
    %249 = arith.ori %247, %248 : vector<8x1xi32>
    %250 = vector.broadcast %249 : vector<8x1xi32> to vector<8x128xi32>
    %251 = arith.cmpi sge, %15, %250 : vector<8x128xi32>
    %252 = arith.extui %251 : vector<8x128xi1> to vector<8x128xi32>
    %253 = arith.sitofp %252 : vector<8x128xi32> to vector<8x128xf32>
    %cst_54 = arith.constant dense<0.000000e+00> : vector<8xf32>
    %254 = vector.multi_reduction <add>, %253, %cst_54 [1] : vector<8x128xf32> to vector<8xf32>
    %255 = vector.shape_cast %254 : vector<8xf32> to vector<8x1xf32>
    %cst_55 = arith.constant 1.900000e+01 : f32
    %256 = vector.broadcast %cst_55 : f32 to vector<8x1xf32>
    %257 = arith.cmpf oge, %255, %256 : vector<8x1xf32>
    %258 = arith.select %257, %249, %247 : vector<8x1xi1>, vector<8x1xi32>
    %c256_i32 = arith.constant 256 : i32
    %259 = vector.broadcast %c256_i32 : i32 to vector<8x1xi32>
    %260 = arith.ori %258, %259 : vector<8x1xi32>
    %261 = vector.broadcast %260 : vector<8x1xi32> to vector<8x128xi32>
    %262 = arith.cmpi sge, %15, %261 : vector<8x128xi32>
    %263 = arith.extui %262 : vector<8x128xi1> to vector<8x128xi32>
    %264 = arith.sitofp %263 : vector<8x128xi32> to vector<8x128xf32>
    %cst_56 = arith.constant dense<0.000000e+00> : vector<8xf32>
    %265 = vector.multi_reduction <add>, %264, %cst_56 [1] : vector<8x128xf32> to vector<8xf32>
    %266 = vector.shape_cast %265 : vector<8xf32> to vector<8x1xf32>
    %cst_57 = arith.constant 1.900000e+01 : f32
    %267 = vector.broadcast %cst_57 : f32 to vector<8x1xf32>
    %268 = arith.cmpf oge, %266, %267 : vector<8x1xf32>
    %269 = arith.select %268, %260, %258 : vector<8x1xi1>, vector<8x1xi32>
    %c128_i32 = arith.constant 128 : i32
    %270 = vector.broadcast %c128_i32 : i32 to vector<8x1xi32>
    %271 = arith.ori %269, %270 : vector<8x1xi32>
    %272 = vector.broadcast %271 : vector<8x1xi32> to vector<8x128xi32>
    %273 = arith.cmpi sge, %15, %272 : vector<8x128xi32>
    %274 = arith.extui %273 : vector<8x128xi1> to vector<8x128xi32>
    %275 = arith.sitofp %274 : vector<8x128xi32> to vector<8x128xf32>
    %cst_58 = arith.constant dense<0.000000e+00> : vector<8xf32>
    %276 = vector.multi_reduction <add>, %275, %cst_58 [1] : vector<8x128xf32> to vector<8xf32>
    %277 = vector.shape_cast %276 : vector<8xf32> to vector<8x1xf32>
    %cst_59 = arith.constant 1.900000e+01 : f32
    %278 = vector.broadcast %cst_59 : f32 to vector<8x1xf32>
    %279 = arith.cmpf oge, %277, %278 : vector<8x1xf32>
    %280 = arith.select %279, %271, %269 : vector<8x1xi1>, vector<8x1xi32>
    %c64_i32 = arith.constant 64 : i32
    %281 = vector.broadcast %c64_i32 : i32 to vector<8x1xi32>
    %282 = arith.ori %280, %281 : vector<8x1xi32>
    %283 = vector.broadcast %282 : vector<8x1xi32> to vector<8x128xi32>
    %284 = arith.cmpi sge, %15, %283 : vector<8x128xi32>
    %285 = arith.extui %284 : vector<8x128xi1> to vector<8x128xi32>
    %286 = arith.sitofp %285 : vector<8x128xi32> to vector<8x128xf32>
    %cst_60 = arith.constant dense<0.000000e+00> : vector<8xf32>
    %287 = vector.multi_reduction <add>, %286, %cst_60 [1] : vector<8x128xf32> to vector<8xf32>
    %288 = vector.shape_cast %287 : vector<8xf32> to vector<8x1xf32>
    %cst_61 = arith.constant 1.900000e+01 : f32
    %289 = vector.broadcast %cst_61 : f32 to vector<8x1xf32>
    %290 = arith.cmpf oge, %288, %289 : vector<8x1xf32>
    %291 = arith.select %290, %282, %280 : vector<8x1xi1>, vector<8x1xi32>
    %c32_i32 = arith.constant 32 : i32
    %292 = vector.broadcast %c32_i32 : i32 to vector<8x1xi32>
    %293 = arith.ori %291, %292 : vector<8x1xi32>
    %294 = vector.broadcast %293 : vector<8x1xi32> to vector<8x128xi32>
    %295 = arith.cmpi sge, %15, %294 : vector<8x128xi32>
    %296 = arith.extui %295 : vector<8x128xi1> to vector<8x128xi32>
    %297 = arith.sitofp %296 : vector<8x128xi32> to vector<8x128xf32>
    %cst_62 = arith.constant dense<0.000000e+00> : vector<8xf32>
    %298 = vector.multi_reduction <add>, %297, %cst_62 [1] : vector<8x128xf32> to vector<8xf32>
    %299 = vector.shape_cast %298 : vector<8xf32> to vector<8x1xf32>
    %cst_63 = arith.constant 1.900000e+01 : f32
    %300 = vector.broadcast %cst_63 : f32 to vector<8x1xf32>
    %301 = arith.cmpf oge, %299, %300 : vector<8x1xf32>
    %302 = arith.select %301, %293, %291 : vector<8x1xi1>, vector<8x1xi32>
    %c16_i32 = arith.constant 16 : i32
    %303 = vector.broadcast %c16_i32 : i32 to vector<8x1xi32>
    %304 = arith.ori %302, %303 : vector<8x1xi32>
    %305 = vector.broadcast %304 : vector<8x1xi32> to vector<8x128xi32>
    %306 = arith.cmpi sge, %15, %305 : vector<8x128xi32>
    %307 = arith.extui %306 : vector<8x128xi1> to vector<8x128xi32>
    %308 = arith.sitofp %307 : vector<8x128xi32> to vector<8x128xf32>
    %cst_64 = arith.constant dense<0.000000e+00> : vector<8xf32>
    %309 = vector.multi_reduction <add>, %308, %cst_64 [1] : vector<8x128xf32> to vector<8xf32>
    %310 = vector.shape_cast %309 : vector<8xf32> to vector<8x1xf32>
    %cst_65 = arith.constant 1.900000e+01 : f32
    %311 = vector.broadcast %cst_65 : f32 to vector<8x1xf32>
    %312 = arith.cmpf oge, %310, %311 : vector<8x1xf32>
    %313 = arith.select %312, %304, %302 : vector<8x1xi1>, vector<8x1xi32>
    %c8_i32 = arith.constant 8 : i32
    %314 = vector.broadcast %c8_i32 : i32 to vector<8x1xi32>
    %315 = arith.ori %313, %314 : vector<8x1xi32>
    %316 = vector.broadcast %315 : vector<8x1xi32> to vector<8x128xi32>
    %317 = arith.cmpi sge, %15, %316 : vector<8x128xi32>
    %318 = arith.extui %317 : vector<8x128xi1> to vector<8x128xi32>
    %319 = arith.sitofp %318 : vector<8x128xi32> to vector<8x128xf32>
    %cst_66 = arith.constant dense<0.000000e+00> : vector<8xf32>
    %320 = vector.multi_reduction <add>, %319, %cst_66 [1] : vector<8x128xf32> to vector<8xf32>
    %321 = vector.shape_cast %320 : vector<8xf32> to vector<8x1xf32>
    %cst_67 = arith.constant 1.900000e+01 : f32
    %322 = vector.broadcast %cst_67 : f32 to vector<8x1xf32>
    %323 = arith.cmpf oge, %321, %322 : vector<8x1xf32>
    %324 = arith.select %323, %315, %313 : vector<8x1xi1>, vector<8x1xi32>
    %c4_i32 = arith.constant 4 : i32
    %325 = vector.broadcast %c4_i32 : i32 to vector<8x1xi32>
    %326 = arith.ori %324, %325 : vector<8x1xi32>
    %327 = vector.broadcast %326 : vector<8x1xi32> to vector<8x128xi32>
    %328 = arith.cmpi sge, %15, %327 : vector<8x128xi32>
    %329 = arith.extui %328 : vector<8x128xi1> to vector<8x128xi32>
    %330 = arith.sitofp %329 : vector<8x128xi32> to vector<8x128xf32>
    %cst_68 = arith.constant dense<0.000000e+00> : vector<8xf32>
    %331 = vector.multi_reduction <add>, %330, %cst_68 [1] : vector<8x128xf32> to vector<8xf32>
    %332 = vector.shape_cast %331 : vector<8xf32> to vector<8x1xf32>
    %cst_69 = arith.constant 1.900000e+01 : f32
    %333 = vector.broadcast %cst_69 : f32 to vector<8x1xf32>
    %334 = arith.cmpf oge, %332, %333 : vector<8x1xf32>
    %335 = arith.select %334, %326, %324 : vector<8x1xi1>, vector<8x1xi32>
    %c2_i32 = arith.constant 2 : i32
    %336 = vector.broadcast %c2_i32 : i32 to vector<8x1xi32>
    %337 = arith.ori %335, %336 : vector<8x1xi32>
    %338 = vector.broadcast %337 : vector<8x1xi32> to vector<8x128xi32>
    %339 = arith.cmpi sge, %15, %338 : vector<8x128xi32>
    %340 = arith.extui %339 : vector<8x128xi1> to vector<8x128xi32>
    %341 = arith.sitofp %340 : vector<8x128xi32> to vector<8x128xf32>
    %cst_70 = arith.constant dense<0.000000e+00> : vector<8xf32>
    %342 = vector.multi_reduction <add>, %341, %cst_70 [1] : vector<8x128xf32> to vector<8xf32>
    %343 = vector.shape_cast %342 : vector<8xf32> to vector<8x1xf32>
    %cst_71 = arith.constant 1.900000e+01 : f32
    %344 = vector.broadcast %cst_71 : f32 to vector<8x1xf32>
    %345 = arith.cmpf oge, %343, %344 : vector<8x1xf32>
    %346 = arith.select %345, %337, %335 : vector<8x1xi1>, vector<8x1xi32>
    %c1_i32 = arith.constant 1 : i32
    %347 = vector.broadcast %c1_i32 : i32 to vector<8x1xi32>
    %348 = arith.ori %346, %347 : vector<8x1xi32>
    %349 = vector.broadcast %348 : vector<8x1xi32> to vector<8x128xi32>
    %350 = arith.cmpi sge, %15, %349 : vector<8x128xi32>
    %351 = arith.extui %350 : vector<8x128xi1> to vector<8x128xi32>
    %352 = arith.sitofp %351 : vector<8x128xi32> to vector<8x128xf32>
    %cst_72 = arith.constant dense<0.000000e+00> : vector<8xf32>
    %353 = vector.multi_reduction <add>, %352, %cst_72 [1] : vector<8x128xf32> to vector<8xf32>
    %354 = vector.shape_cast %353 : vector<8xf32> to vector<8x1xf32>
    %cst_73 = arith.constant 1.900000e+01 : f32
    %355 = vector.broadcast %cst_73 : f32 to vector<8x1xf32>
    %356 = arith.cmpf oge, %354, %355 : vector<8x1xf32>
    %357 = arith.select %356, %348, %346 : vector<8x1xi1>, vector<8x1xi32>
    %358 = vector.broadcast %357 : vector<8x1xi32> to vector<8x128xi32>
    %359 = arith.cmpi sge, %15, %358 : vector<8x128xi32>
    %cst_74 = arith.constant 0.000000e+00 : f32
    %360 = vector.broadcast %cst_74 : f32 to vector<8x128xf32>
    %361 = arith.select %359, %14, %360 : vector<8x128xi1>, vector<8x128xf32>
    %c0_75 = arith.constant 0 : index
    %c0_76 = arith.constant 0 : index
    %362 = vector.load %arg6[%c0_75, %c0_76] : memref<128x128xf32, #tpu.memory_space<vmem>>, vector<128x128xf32>
    %cst_77 = arith.constant dense<0.000000e+00> : vector<8x128xf32>
    %363 = tpu.matmul %361, %362, %cst_77 {dimension_numbers = #tpu.dot_dimension_numbers<[1], [0], [0], [1], [0, 0, 1, 1], [], []>} : vector<8x128xf32>, vector<128x128xf32>, vector<8x128xf32> -> vector<8x128xf32>
    %c0_78 = arith.constant 0 : index
    %c0_79 = arith.constant 0 : index
    %364 = vector.load %arg7[%c0_78, %c0_79] : memref<1x128xf32, #tpu.memory_space<vmem>>, vector<1x128xf32>
    %365 = vector.broadcast %364 : vector<1x128xf32> to vector<8x128xf32>
    %366 = arith.addf %363, %365 : vector<8x128xf32>
    %cst_80 = arith.constant 0.000000e+00 : f32
    %367 = vector.broadcast %cst_80 : f32 to vector<8x128xf32>
    %368 = arith.subf %367, %366 : vector<8x128xf32>
    %369 = math.exp %368 : vector<8x128xf32>
    %cst_81 = arith.constant 1.000000e+00 : f32
    %370 = vector.broadcast %cst_81 : f32 to vector<8x128xf32>
    %371 = arith.addf %370, %369 : vector<8x128xf32>
    %372 = tpu.reciprocal %371 {approx = true} : vector<8x128xf32> -> vector<8x128xf32>
    %c0_82 = arith.constant 0 : index
    %c0_83 = arith.constant 0 : index
    %373 = vector.load %arg8[%c0_82, %c0_83] : memref<8x128xf32, #tpu.memory_space<vmem>>, vector<8x128xf32>
    tpu.vector_store %arg8[%c0_82, %c0_83], %372 {strides = array<i32>} : memref<8x128xf32, #tpu.memory_space<vmem>>, vector<8x128xf32>,
    return
  }
  func.func @transform_0(%arg0: i32) -> (i32, i32) {
    %c0_i32 = arith.constant 0 : i32
    %c0_i32_0 = arith.constant 0 : i32
    return %arg0, %c0_i32 : i32, i32
  }
  func.func @transform_1(%arg0: i32) -> (i32, i32) {
    %c0_i32 = arith.constant 0 : i32
    %c0_i32_0 = arith.constant 0 : i32
    %c0_i32_1 = arith.constant 0 : i32
    return %c0_i32, %c0_i32_0 : i32, i32
  }
  func.func @transform_2(%arg0: i32) -> (i32, i32) {
    %c0_i32 = arith.constant 0 : i32
    %c0_i32_0 = arith.constant 0 : i32
    %c0_i32_1 = arith.constant 0 : i32
    return %c0_i32, %c0_i32_0 : i32, i32
  }
  func.func @transform_3(%arg0: i32) -> (i32, i32) {
    %c0_i32 = arith.constant 0 : i32
    %c0_i32_0 = arith.constant 0 : i32
    %c0_i32_1 = arith.constant 0 : i32
    return %c0_i32, %c0_i32_0 : i32, i32
  }
  func.func @transform_4(%arg0: i32) -> (i32, i32) {
    %c0_i32 = arith.constant 0 : i32
    %c0_i32_0 = arith.constant 0 : i32
    %c0_i32_1 = arith.constant 0 : i32
    return %c0_i32, %c0_i32_0 : i32, i32
  }
  func.func @transform_5(%arg0: i32) -> (i32, i32) {
    %c0_i32 = arith.constant 0 : i32
    %c0_i32_0 = arith.constant 0 : i32
    %c0_i32_1 = arith.constant 0 : i32
    return %c0_i32, %c0_i32_0 : i32, i32
  }
  func.func @transform_6(%arg0: i32) -> (i32, i32) {
    %c0_i32 = arith.constant 0 : i32
    %c0_i32_0 = arith.constant 0 : i32
    %c0_i32_1 = arith.constant 0 : i32
    return %c0_i32, %c0_i32_0 : i32, i32
  }
  func.func @transform_7(%arg0: i32) -> (i32, i32) {
    %c0_i32 = arith.constant 0 : i32
    %c0_i32_0 = arith.constant 0 : i32
    return %arg0, %c0_i32 : i32, i32
  }
}

</mosaic_0001>

<bundles_post_ra>
// kernel: mlp_autoencoder_forward.1
= control target key start
LH: loop header
LB: loop body
LE: loop exit
PB: predicated region body
PF: predicated region fallthrough
CT: control target
= control target key end

     0   :  { %v450_v41 = vmov 0.0   ;;  %v451_v44 = vmov 0   ;;  %s717_s1 = inlined_call_operand.vmem [shape: f32[128,128], index: 1, kind: input, shape index: {}]   ;;  %s718_s3 = inlined_call_operand.vmem [shape: f32[128,128], index: 3, kind: input, shape index: {}]   ;;  %s719_s2 = inlined_call_operand.vmem [shape: f32[1,128], index: 2, kind: input, shape index: {}]   ;;  %s720_s0 = inlined_call_operand.vmem [shape: f32[8,128], index: 0, kind: input, shape index: {}]   ;;  %s721_s4 = inlined_call_operand.vmem [shape: f32[1,128], index: 4, kind: input, shape index: {}]   ;;  %s722_s5 = inlined_call_operand.vmem [shape: f32[128,128], index: 5, kind: input, shape index: {}]   ;;  %s723_s6 = inlined_call_operand.vmem [shape: f32[1,128], index: 6, kind: input, shape index: {}]   ;;  %s724_s7 = inlined_call_operand.vmem [shape: f32[8,128], index: 7, kind: output, shape index: {}]  }
   0x1   :  { %v42_v0 = vld [vmem:[%s717_s1 + $0x78] sm:$0xff]  ;;  %v41_v1 = vld [vmem:[%s717_s1 + $0x70] sm:$0xff]  ;;  %v40_v2 = vld [vmem:[%s717_s1 + $0x68] sm:$0xff] }
   0x2   :  { %47 = vmatpush.msra.mxu0 %v42_v0  ;;  %v39_v3 = vld [vmem:[%s717_s1 + $0x60] sm:$0xff]  ;;  %v83_v4 = vld [vmem:[%s718_s3 + $0x78] sm:$0xff]  ;;  %v82_v6 = vld [vmem:[%s718_s3 + $0x70] sm:$0xff] }
   0x3   :  { %v38_v5 = vld [vmem:[%s717_s1 + $0x58] sm:$0xff]  ;;  %88 = vmatpush.msra.mxu1 %v83_v4  ;;  %v81_v7 = vld [vmem:[%s718_s3 + $0x68] sm:$0xff]  ;;  %v37_v8 = vld [vmem:[%s717_s1 + $0x50] sm:$0xff] }
   0x4   :  { %48 = vmatpush.msra.mxu0 %v41_v1  ;;  %v80_v9 = vld [vmem:[%s718_s3 + $0x60] sm:$0xff]  ;;  %v36_v10 = vld [vmem:[%s717_s1 + $0x48] sm:$0xff]  ;;  %v79_v11 = vld [vmem:[%s718_s3 + $0x58] sm:$0xff] }
   0x5   :  { %89 = vmatpush.msra.mxu1 %v82_v6  ;;  %v35_v12 = vld [vmem:[%s717_s1 + $0x40] sm:$0xff]  ;;  %v78_v13 = vld [vmem:[%s718_s3 + $0x50] sm:$0xff]  ;;  %v34_v14 = vld [vmem:[%s717_s1 + $0x38] sm:$0xff] }
   0x6   :  { %49 = vmatpush.msra.mxu0 %v40_v2  ;;  %v77_v15 = vld [vmem:[%s718_s3 + $0x48] sm:$0xff]  ;;  %v33_v16 = vld [vmem:[%s717_s1 + $0x30] sm:$0xff]  ;;  %v76_v17 = vld [vmem:[%s718_s3 + $0x40] sm:$0xff] }
   0x7   :  { %90 = vmatpush.msra.mxu1 %v81_v7  ;;  %v32_v18 = vld [vmem:[%s717_s1 + $0x28] sm:$0xff]  ;;  %v75_v19 = vld [vmem:[%s718_s3 + $0x38] sm:$0xff]  ;;  %v31_v20 = vld [vmem:[%s717_s1 + $0x20] sm:$0xff] }
   0x8   :  { %50 = vmatpush.msra.mxu0 %v39_v3  ;;  %v74_v21 = vld [vmem:[%s718_s3 + $0x30] sm:$0xff]  ;;  %v30_v22 = vld [vmem:[%s717_s1 + $0x18] sm:$0xff]  ;;  %v73_v23 = vld [vmem:[%s718_s3 + $0x28] sm:$0xff] }
   0x9   :  { %91 = vmatpush.msra.mxu1 %v80_v9  ;;  %v29_v24 = vld [vmem:[%s717_s1 + $0x10] sm:$0xff]  ;;  %v72_v25 = vld [vmem:[%s718_s3 + $0x20] sm:$0xff]  ;;  %v28_v26 = vld [vmem:[%s717_s1 + $0x8] sm:$0xff] }
   0xa   :  { %51 = vmatpush.msra.mxu0 %v38_v5  ;;  %v71_v27 = vld [vmem:[%s718_s3 + $0x18] sm:$0xff]  ;;  %v27_v28 = vld [vmem:[%s717_s1] sm:$0xff]  ;;  %v70_v30 = vld [vmem:[%s718_s3 + $0x10] sm:$0xff] }
   0xb   :  { %92 = vmatpush.msra.mxu1 %v79_v11  ;;  %v26_v29 = vld [vmem:[%s720_s0] sm:$0xff]  ;;  %v69_v31 = vld [vmem:[%s718_s3 + $0x8] sm:$0xff] }
   0xc   :  { %52 = vmatpush.msra.mxu0 %v37_v8  ;;  %v68_v32 = vld [vmem:[%s718_s3] sm:$0xff] }
   0xd   :  { %93 = vmatpush.msra.mxu1 %v78_v13  ;;  %v443_v33 = vld [vmem:[%s719_s2] ss:$0 sm:$0xff] }
   0xe   :  { %53 = vmatpush.msra.mxu0 %v36_v10  ;;  %v444_v37 = vld [vmem:[%s721_s4] ss:$0 sm:$0xff] }
   0xf   :  { %94 = vmatpush.msra.mxu1 %v77_v15 }
  0x10   :  { %54 = vmatpush.msra.mxu0 %v35_v12 }
  0x11   :  { %95 = vmatpush.msra.mxu1 %v76_v17 }
  0x12   :  { %55 = vmatpush.msra.mxu0 %v34_v14 }
  0x13   :  { %96 = vmatpush.msra.mxu1 %v75_v19 }
  0x14   :  { %56 = vmatpush.msra.mxu0 %v33_v16 }
  0x15   :  { %97 = vmatpush.msra.mxu1 %v74_v21 }
  0x16   :  { %57 = vmatpush.msra.mxu0 %v32_v18 }
  0x17   :  { %98 = vmatpush.msra.mxu1 %v73_v23 }
  0x18   :  { %58 = vmatpush.msra.mxu0 %v31_v20 }
  0x19   :  { %99 = vmatpush.msra.mxu1 %v72_v25 }
  0x1a   :  { %59 = vmatpush.msra.mxu0 %v30_v22 }
  0x1b   :  { %100 = vmatpush.msra.mxu1 %v71_v27 }
  0x1c   :  { %60 = vmatpush.msra.mxu0 %v29_v24 }
  0x1d   :  { %101 = vmatpush.msra.mxu1 %v70_v30 }
  0x1e   :  { %61 = vmatpush.msra.mxu0 %v28_v26 }
  0x1f   :  { %102 = vmatpush.msra.mxu1 %v69_v31 }
  0x20   :  { %62 = vmatpush.msra.mxu0 %v27_v28 }
  0x21   :  { %63 = vmatmul.f32.vlgmr.msra.gmra.mxu0 %v26_v29  ;;  %103 = vmatpush.msra.mxu1 %v68_v32 }
  0x9e   :  { %v64_v34 = vpop.f32.mrf.mxu0 }
  0x9f   :  { %v65_v35 = vadd.f32 %v443_v33, %v64_v34 }
  0xa1   :  { %v67_v36 = vmax.f32 %v65_v35, 0.0 }
  0xa3   :  { %104 = vmatmul.f32.vlgmr.msra.gmra.mxu1 %v67_v36 }
 0x120   :  { %v105_v38 = vpop.f32.mrf.mxu1 }
 0x121   :  { %v106_v39 = vadd.f32 %v444_v37, %v105_v38 }
 0x123   :  { %v597_v40 = vmax.f32 %v106_v39, 0.0 }
 0x125   :  { %vm110_vm0 = vcmp.ge.s32.totalorder %v597_v40, 1073741824 }
 0x126   :  { %v409_v42 = vsel %vm110_vm0, 1.0, %v450_v41 }
 0x127   :  { %113 = vadd.xlane.f32.xlu0 %v409_v42 }
 0x19a   :  { %v114_v43 = vpop.xlane.xlu0 %113 }
 0x19b   :  { %vm115_vm1 = vcmp.ge.f32.partialorder %v114_v43, 19.0 }
 0x19c   :  { %v116_v45 = vsel %vm115_vm1, 1073741824, %v451_v44 }
 0x19d   :  { %v117_v46 = vor.u32 536870912, %v116_v45 }
 0x19f   :  { %vm118_vm2 = vcmp.ge.s32.totalorder %v597_v40, %v117_v46 }
 0x1a0   :  { %v410_v47 = vsel %vm118_vm2, 1.0, %v450_v41 }
 0x1a1   :  { %121 = vadd.xlane.f32.xlu0 %v410_v47 }
 0x214   :  { %v122_v48 = vpop.xlane.xlu0 %121 }
 0x215   :  { %vm123_vm3 = vcmp.ge.f32.partialorder %v122_v48, 19.0 }
 0x216   :  { %v124_v49 = vsel %vm123_vm3, %v117_v46, %v116_v45 }
 0x217   :  { %v125_v50 = vor.u32 268435456, %v124_v49 }
 0x219   :  { %vm126_vm4 = vcmp.ge.s32.totalorder %v597_v40, %v125_v50 }
 0x21a   :  { %v411_v51 = vsel %vm126_vm4, 1.0, %v450_v41 }
 0x21b   :  { %129 = vadd.xlane.f32.xlu1 %v411_v51 }
 0x28e   :  { %v130_v52 = vpop.xlane.xlu1 %129 }
 0x28f   :  { %vm131_vm5 = vcmp.ge.f32.partialorder %v130_v52, 19.0 }
 0x290   :  { %v132_v53 = vsel %vm131_vm5, %v125_v50, %v124_v49 }
 0x291   :  { %v133_v54 = vor.u32 134217728, %v132_v53 }
 0x293   :  { %vm134_vm6 = vcmp.ge.s32.totalorder %v597_v40, %v133_v54 }
 0x294   :  { %v412_v55 = vsel %vm134_vm6, 1.0, %v450_v41 }
 0x295   :  { %137 = vadd.xlane.f32.xlu1 %v412_v55 }
 0x308   :  { %v138_v56 = vpop.xlane.xlu1 %137 }
 0x309   :  { %vm139_vm7 = vcmp.ge.f32.partialorder %v138_v56, 19.0 }
 0x30a   :  { %v140_v57 = vsel %vm139_vm7, %v133_v54, %v132_v53 }
 0x30b   :  { %v141_v58 = vor.u32 67108864, %v140_v57 }
 0x30d   :  { %vm142_vm8 = vcmp.ge.s32.totalorder %v597_v40, %v141_v58 }
 0x30e   :  { %v413_v59 = vsel %vm142_vm8, 1.0, %v450_v41 }
 0x30f   :  { %145 = vadd.xlane.f32.xlu2 %v413_v59 }
 0x382   :  { %v146_v60 = vpop.xlane.xlu2 %145 }
 0x383   :  { %vm147_vm9 = vcmp.ge.f32.partialorder %v146_v60, 19.0 }
 0x384   :  { %v148_v61 = vsel %vm147_vm9, %v141_v58, %v140_v57 }
 0x385   :  { %v149_v62 = vor.u32 33554432, %v148_v61 }
 0x387   :  { %vm150_vm10 = vcmp.ge.s32.totalorder %v597_v40, %v149_v62 }
 0x388   :  { %v414_v63 = vsel %vm150_vm10, 1.0, %v450_v41 }
 0x389   :  { %153 = vadd.xlane.f32.xlu2 %v414_v63 }
 0x3fc   :  { %v154_v0 = vpop.xlane.xlu2 %153 }
 0x3fd   :  { %vm155_vm11 = vcmp.ge.f32.partialorder %v154_v0, 19.0 }
 0x3fe   :  { %v156_v1 = vsel %vm155_vm11, %v149_v62, %v148_v61 }
 0x3ff   :  { %v157_v2 = vor.u32 16777216, %v156_v1 }
 0x401   :  { %vm158_vm12 = vcmp.ge.s32.totalorder %v597_v40, %v157_v2 }
 0x402   :  { %v415_v3 = vsel %vm158_vm12, 1.0, %v450_v41 }
 0x403   :  { %161 = vadd.xlane.f32.xlu0 %v415_v3 }
 0x476   :  { %v162_v4 = vpop.xlane.xlu0 %161 }
 0x477   :  { %vm163_vm13 = vcmp.ge.f32.partialorder %v162_v4, 19.0 }
 0x478   :  { %v164_v5 = vsel %vm163_vm13, %v157_v2, %v156_v1 }
 0x479   :  { %v165_v6 = vor.u32 8388608, %v164_v5 }
 0x47b   :  { %vm166_vm14 = vcmp.ge.s32.totalorder %v597_v40, %v165_v6 }
 0x47c   :  { %v416_v7 = vsel %vm166_vm14, 1.0, %v450_v41 }
 0x47d   :  { %169 = vadd.xlane.f32.xlu1 %v416_v7 }
 0x4f0   :  { %v170_v8 = vpop.xlane.xlu1 %169 }
 0x4f1   :  { %vm171_vm15 = vcmp.ge.f32.partialorder %v170_v8, 19.0 }
 0x4f2   :  { %v172_v9 = vsel %vm171_vm15, %v165_v6, %v164_v5 }
 0x4f3   :  { %v173_v10 = vor.u32 4194304, %v172_v9 }
 0x4f5   :  { %vm174_vm0 = vcmp.ge.s32.totalorder %v597_v40, %v173_v10 }
 0x4f6   :  { %v417_v11 = vsel %vm174_vm0, 1.0, %v450_v41 }
 0x4f7   :  { %177 = vadd.xlane.f32.xlu2 %v417_v11 }
 0x56a   :  { %v178_v12 = vpop.xlane.xlu2 %177 }
 0x56b   :  { %vm179_vm1 = vcmp.ge.f32.partialorder %v178_v12, 19.0 }
 0x56c   :  { %v180_v13 = vsel %vm179_vm1, %v173_v10, %v172_v9 }
 0x56d   :  { %v181_v14 = vor.u32 2097152, %v180_v13 }
 0x56f   :  { %vm182_vm2 = vcmp.ge.s32.totalorder %v597_v40, %v181_v14 }
 0x570   :  { %v418_v15 = vsel %vm182_vm2, 1.0, %v450_v41 }
 0x571   :  { %185 = vadd.xlane.f32.xlu0 %v418_v15 }
 0x5e4   :  { %v186_v16 = vpop.xlane.xlu0 %185 }
 0x5e5   :  { %vm187_vm3 = vcmp.ge.f32.partialorder %v186_v16, 19.0 }
 0x5e6   :  { %v188_v17 = vsel %vm187_vm3, %v181_v14, %v180_v13 }
 0x5e7   :  { %v189_v18 = vor.u32 1048576, %v188_v17 }
 0x5e9   :  { %vm190_vm4 = vcmp.ge.s32.totalorder %v597_v40, %v189_v18 }
 0x5ea   :  { %v419_v19 = vsel %vm190_vm4, 1.0, %v450_v41 }
 0x5eb   :  { %193 = vadd.xlane.f32.xlu1 %v419_v19 }
 0x65e   :  { %v194_v20 = vpop.xlane.xlu1 %193 }
 0x65f   :  { %vm195_vm5 = vcmp.ge.f32.partialorder %v194_v20, 19.0 }
 0x660   :  { %v196_v21 = vsel %vm195_vm5, %v189_v18, %v188_v17 }
 0x661   :  { %v197_v22 = vor.u32 524288, %v196_v21 }
 0x663   :  { %vm198_vm6 = vcmp.ge.s32.totalorder %v597_v40, %v197_v22 }
 0x664   :  { %v420_v23 = vsel %vm198_vm6, 1.0, %v450_v41 }
 0x665   :  { %201 = vadd.xlane.f32.xlu2 %v420_v23 }
 0x6d8   :  { %v202_v24 = vpop.xlane.xlu2 %201 }
 0x6d9   :  { %vm203_vm7 = vcmp.ge.f32.partialorder %v202_v24, 19.0 }
 0x6da   :  { %v204_v25 = vsel %vm203_vm7, %v197_v22, %v196_v21 }
 0x6db   :  { %v205_v26 = vor.u32 262144, %v204_v25 }
 0x6dd   :  { %vm206_vm8 = vcmp.ge.s32.totalorder %v597_v40, %v205_v26 }
 0x6de   :  { %v421_v27 = vsel %vm206_vm8, 1.0, %v450_v41 }
 0x6df   :  { %209 = vadd.xlane.f32.xlu0 %v421_v27 }
 0x752   :  { %v210_v28 = vpop.xlane.xlu0 %209 }
 0x753   :  { %vm211_vm9 = vcmp.ge.f32.partialorder %v210_v28, 19.0 }
 0x754   :  { %v212_v29 = vsel %vm211_vm9, %v205_v26, %v204_v25 }
 0x755   :  { %v213_v30 = vor.u32 131072, %v212_v29 }
 0x757   :  { %vm214_vm10 = vcmp.ge.s32.totalorder %v597_v40, %v213_v30 }
 0x758   :  { %v422_v31 = vsel %vm214_vm10, 1.0, %v450_v41 }
 0x759   :  { %217 = vadd.xlane.f32.xlu1 %v422_v31 }
 0x7cc   :  { %v218_v32 = vpop.xlane.xlu1 %217 }
 0x7cd   :  { %vm219_vm11 = vcmp.ge.f32.partialorder %v218_v32, 19.0 }
 0x7ce   :  { %v220_v33 = vsel %vm219_vm11, %v213_v30, %v212_v29 }
 0x7cf   :  { %v221_v34 = vor.u32 65536, %v220_v33 }
 0x7d1   :  { %vm222_vm12 = vcmp.ge.s32.totalorder %v597_v40, %v221_v34 }
 0x7d2   :  { %v423_v35 = vsel %vm222_vm12, 1.0, %v450_v41 }
 0x7d3   :  { %225 = vadd.xlane.f32.xlu2 %v423_v35  ;;  %v373_v35 = vld [vmem:[%s722_s5 + $0x70] sm:$0xff] }
 0x846   :  { %v226_v36 = vpop.xlane.xlu2 %225 }
 0x847   :  { %vm227_vm13 = vcmp.ge.f32.partialorder %v226_v36, 19.0  ;;  %v372_v36 = vld [vmem:[%s722_s5 + $0x68] sm:$0xff] }
 0x848   :  { %v228_v37 = vsel %vm227_vm13, %v221_v34, %v220_v33  ;;  %v374_v34 = vld [vmem:[%s722_s5 + $0x78] sm:$0xff] }
 0x849   :  { %v229_v38 = vor.u32 32768, %v228_v37  ;;  %379 = vmatpush.msra.mxu2 %v374_v34 }
 0x84b   :  { %vm230_vm14 = vcmp.ge.s32.totalorder %v597_v40, %v229_v38  ;;  %380 = vmatpush.msra.mxu2 %v373_v35 }
 0x84c   :  { %v424_v39 = vsel %vm230_vm14, 1.0, %v450_v41 }
 0x84d   :  { %233 = vadd.xlane.f32.xlu0 %v424_v39  ;;  %381 = vmatpush.msra.mxu2 %v372_v36  ;;  %v369_v39 = vld [vmem:[%s722_s5 + $0x50] sm:$0xff] }
 0x8c0   :  { %v234_v42 = vpop.xlane.xlu0 %233 }
 0x8c1   :  { %vm235_vm15 = vcmp.ge.f32.partialorder %v234_v42, 19.0  ;;  %v368_v42 = vld [vmem:[%s722_s5 + $0x48] sm:$0xff] }
 0x8c2   :  { %v236_v43 = vsel %vm235_vm15, %v229_v38, %v228_v37  ;;  %v371_v37 = vld [vmem:[%s722_s5 + $0x60] sm:$0xff]  ;;  %v370_v38 = vld [vmem:[%s722_s5 + $0x58] sm:$0xff] }
 0x8c3   :  { %v237_v44 = vor.u32 16384, %v236_v43  ;;  %382 = vmatpush.msra.mxu2 %v371_v37 }
 0x8c5   :  { %vm238_vm0 = vcmp.ge.s32.totalorder %v597_v40, %v237_v44  ;;  %383 = vmatpush.msra.mxu2 %v370_v38 }
 0x8c6   :  { %v425_v45 = vsel %vm238_vm0, 1.0, %v450_v41 }
 0x8c7   :  { %241 = vadd.xlane.f32.xlu1 %v425_v45  ;;  %384 = vmatpush.msra.mxu2 %v369_v39  ;;  %v365_v45 = vld [vmem:[%s722_s5 + $0x30] sm:$0xff] }
 0x8c9   :  { %385 = vmatpush.msra.mxu2 %v368_v42 }
 0x93a   :  { %v242_v46 = vpop.xlane.xlu1 %241 }
 0x93b   :  { %vm243_vm1 = vcmp.ge.f32.partialorder %v242_v46, 19.0  ;;  %v364_v46 = vld [vmem:[%s722_s5 + $0x28] sm:$0xff] }
 0x93c   :  { %v244_v47 = vsel %vm243_vm1, %v237_v44, %v236_v43  ;;  %v367_v43 = vld [vmem:[%s722_s5 + $0x40] sm:$0xff]  ;;  %v366_v44 = vld [vmem:[%s722_s5 + $0x38] sm:$0xff] }
 0x93d   :  { %v245_v48 = vor.u32 8192, %v244_v47  ;;  %386 = vmatpush.msra.mxu2 %v367_v43 }
 0x93f   :  { %vm246_vm2 = vcmp.ge.s32.totalorder %v597_v40, %v245_v48  ;;  %387 = vmatpush.msra.mxu2 %v366_v44 }
 0x940   :  { %v426_v49 = vsel %vm246_vm2, 1.0, %v450_v41 }
 0x941   :  { %249 = vadd.xlane.f32.xlu2 %v426_v49  ;;  %388 = vmatpush.msra.mxu2 %v365_v45  ;;  %v361_v49 = vld [vmem:[%s722_s5 + $0x10] sm:$0xff] }
 0x943   :  { %389 = vmatpush.msra.mxu2 %v364_v46 }
 0x9b4   :  { %v250_v50 = vpop.xlane.xlu2 %249 }
 0x9b5   :  { %vm251_vm3 = vcmp.ge.f32.partialorder %v250_v50, 19.0 }
 0x9b6   :  { %v252_v51 = vsel %vm251_vm3, %v245_v48, %v244_v47  ;;  %v363_v47 = vld [vmem:[%s722_s5 + $0x20] sm:$0xff]  ;;  %v362_v48 = vld [vmem:[%s722_s5 + $0x18] sm:$0xff] }
 0x9b7   :  { %v253_v52 = vor.u32 4096, %v252_v51  ;;  %390 = vmatpush.msra.mxu2 %v363_v47 }
 0x9b9   :  { %vm254_vm4 = vcmp.ge.s32.totalorder %v597_v40, %v253_v52  ;;  %391 = vmatpush.msra.mxu2 %v362_v48 }
 0x9ba   :  { %v427_v53 = vsel %vm254_vm4, 1.0, %v450_v41 }
 0x9bb   :  { %257 = vadd.xlane.f32.xlu0 %v427_v53  ;;  %392 = vmatpush.msra.mxu2 %v361_v49 }
 0xa2e   :  { %v258_v54 = vpop.xlane.xlu0 %257 }
 0xa2f   :  { %vm259_vm5 = vcmp.ge.f32.partialorder %v258_v54, 19.0  ;;  %v360_v54 = vld [vmem:[%s722_s5 + $0x8] sm:$0xff] }
 0xa30   :  { %v260_v55 = vsel %vm259_vm5, %v253_v52, %v252_v51  ;;  %393 = vmatpush.msra.mxu2 %v360_v54 }
 0xa31   :  { %v261_v56 = vor.u32 2048, %v260_v55 }
 0xa33   :  { %vm262_vm6 = vcmp.ge.s32.totalorder %v597_v40, %v261_v56 }
 0xa34   :  { %v428_v57 = vsel %vm262_vm6, 1.0, %v450_v41 }
 0xa35   :  { %265 = vadd.xlane.f32.xlu1 %v428_v57 }
 0xaa8   :  { %v266_v58 = vpop.xlane.xlu1 %265 }
 0xaa9   :  { %vm267_vm7 = vcmp.ge.f32.partialorder %v266_v58, 19.0 }
 0xaaa   :  { %v268_v59 = vsel %vm267_vm7, %v261_v56, %v260_v55  ;;  %v359_v55 = vld [vmem:[%s722_s5] sm:$0xff] }
 0xaab   :  { %v269_v60 = vor.u32 1024, %v268_v59  ;;  %394 = vmatpush.msra.mxu2 %v359_v55 }
 0xaad   :  { %vm270_vm8 = vcmp.ge.s32.totalorder %v597_v40, %v269_v60 }
 0xaae   :  { %v429_v61 = vsel %vm270_vm8, 1.0, %v450_v41 }
 0xaaf   :  { %273 = vadd.xlane.f32.xlu2 %v429_v61 }
 0xb22   :  { %v274_v62 = vpop.xlane.xlu2 %273 }
 0xb23   :  { %vm275_vm9 = vcmp.ge.f32.partialorder %v274_v62, 19.0 }
 0xb24   :  { %v276_v63 = vsel %vm275_vm9, %v269_v60, %v268_v59 }
 0xb25   :  { %v277_v0 = vor.u32 512, %v276_v63 }
 0xb27   :  { %vm278_vm10 = vcmp.ge.s32.totalorder %v597_v40, %v277_v0 }
 0xb28   :  { %v430_v1 = vsel %vm278_vm10, 1.0, %v450_v41 }
 0xb29   :  { %281 = vadd.xlane.f32.xlu0 %v430_v1 }
 0xb9c   :  { %v282_v2 = vpop.xlane.xlu0 %281 }
 0xb9d   :  { %vm283_vm11 = vcmp.ge.f32.partialorder %v282_v2, 19.0 }
 0xb9e   :  { %v284_v3 = vsel %vm283_vm11, %v277_v0, %v276_v63 }
 0xb9f   :  { %v285_v4 = vor.u32 256, %v284_v3 }
 0xba1   :  { %vm286_vm12 = vcmp.ge.s32.totalorder %v597_v40, %v285_v4 }
 0xba2   :  { %v431_v5 = vsel %vm286_vm12, 1.0, %v450_v41 }
 0xba3   :  { %289 = vadd.xlane.f32.xlu1 %v431_v5 }
 0xc16   :  { %v290_v6 = vpop.xlane.xlu1 %289 }
 0xc17   :  { %vm291_vm13 = vcmp.ge.f32.partialorder %v290_v6, 19.0 }
 0xc18   :  { %v292_v7 = vsel %vm291_vm13, %v285_v4, %v284_v3 }
 0xc19   :  { %v293_v8 = vor.u32 128, %v292_v7 }
 0xc1b   :  { %vm294_vm14 = vcmp.ge.s32.totalorder %v597_v40, %v293_v8 }
 0xc1c   :  { %v432_v9 = vsel %vm294_vm14, 1.0, %v450_v41 }
 0xc1d   :  { %297 = vadd.xlane.f32.xlu2 %v432_v9 }
 0xc90   :  { %v298_v10 = vpop.xlane.xlu2 %297 }
 0xc91   :  { %vm299_vm15 = vcmp.ge.f32.partialorder %v298_v10, 19.0 }
 0xc92   :  { %v300_v11 = vsel %vm299_vm15, %v293_v8, %v292_v7 }
 0xc93   :  { %v301_v12 = vor.u32 64, %v300_v11 }
 0xc95   :  { %vm302_vm0 = vcmp.ge.s32.totalorder %v597_v40, %v301_v12 }
 0xc96   :  { %v433_v13 = vsel %vm302_vm0, 1.0, %v450_v41 }
 0xc97   :  { %305 = vadd.xlane.f32.xlu0 %v433_v13 }
 0xd0a   :  { %v306_v14 = vpop.xlane.xlu0 %305 }
 0xd0b   :  { %vm307_vm1 = vcmp.ge.f32.partialorder %v306_v14, 19.0 }
 0xd0c   :  { %v308_v15 = vsel %vm307_vm1, %v301_v12, %v300_v11 }
 0xd0d   :  { %v309_v16 = vor.u32 32, %v308_v15 }
 0xd0f   :  { %vm310_vm2 = vcmp.ge.s32.totalorder %v597_v40, %v309_v16 }
 0xd10   :  { %v434_v17 = vsel %vm310_vm2, 1.0, %v450_v41 }
 0xd11   :  { %313 = vadd.xlane.f32.xlu1 %v434_v17 }
 0xd84   :  { %v314_v18 = vpop.xlane.xlu1 %313 }
 0xd85   :  { %vm315_vm3 = vcmp.ge.f32.partialorder %v314_v18, 19.0 }
 0xd86   :  { %v316_v19 = vsel %vm315_vm3, %v309_v16, %v308_v15 }
 0xd87   :  { %v317_v20 = vor.u32 16, %v316_v19 }
 0xd89   :  { %vm318_vm4 = vcmp.ge.s32.totalorder %v597_v40, %v317_v20 }
 0xd8a   :  { %v435_v21 = vsel %vm318_vm4, 1.0, %v450_v41 }
 0xd8b   :  { %321 = vadd.xlane.f32.xlu2 %v435_v21 }
 0xdfe   :  { %v322_v22 = vpop.xlane.xlu2 %321 }
 0xdff   :  { %vm323_vm5 = vcmp.ge.f32.partialorder %v322_v22, 19.0 }
 0xe00   :  { %v324_v23 = vsel %vm323_vm5, %v317_v20, %v316_v19 }
 0xe01   :  { %v325_v24 = vor.u32 8, %v324_v23 }
 0xe03   :  { %vm326_vm6 = vcmp.ge.s32.totalorder %v597_v40, %v325_v24 }
 0xe04   :  { %v436_v25 = vsel %vm326_vm6, 1.0, %v450_v41 }
 0xe05   :  { %329 = vadd.xlane.f32.xlu0 %v436_v25 }
 0xe78   :  { %v330_v26 = vpop.xlane.xlu0 %329 }
 0xe79   :  { %vm331_vm7 = vcmp.ge.f32.partialorder %v330_v26, 19.0 }
 0xe7a   :  { %v332_v27 = vsel %vm331_vm7, %v325_v24, %v324_v23 }
 0xe7b   :  { %v333_v28 = vor.u32 4, %v332_v27 }
 0xe7d   :  { %vm334_vm8 = vcmp.ge.s32.totalorder %v597_v40, %v333_v28 }
 0xe7e   :  { %v437_v29 = vsel %vm334_vm8, 1.0, %v450_v41 }
 0xe7f   :  { %337 = vadd.xlane.f32.xlu1 %v437_v29 }
 0xef2   :  { %v338_v30 = vpop.xlane.xlu1 %337 }
 0xef3   :  { %vm339_vm9 = vcmp.ge.f32.partialorder %v338_v30, 19.0 }
 0xef4   :  { %v340_v31 = vsel %vm339_vm9, %v333_v28, %v332_v27 }
 0xef5   :  { %v341_v32 = vor.u32 2, %v340_v31 }
 0xef7   :  { %vm342_vm10 = vcmp.ge.s32.totalorder %v597_v40, %v341_v32 }
 0xef8   :  { %v438_v33 = vsel %vm342_vm10, 1.0, %v450_v41 }
 0xef9   :  { %345 = vadd.xlane.f32.xlu2 %v438_v33 }
 0xf6c   :  { %v346_v50 = vpop.xlane.xlu2 %345 }
 0xf6d   :  { %vm347_vm11 = vcmp.ge.f32.partialorder %v346_v50, 19.0 }
 0xf6e   :  { %v348_v51 = vsel %vm347_vm11, %v341_v32, %v340_v31 }
 0xf6f   :  { %v349_v52 = vor.u32 1, %v348_v51 }
 0xf71   :  { %vm350_vm12 = vcmp.ge.s32.totalorder %v597_v40, %v349_v52 }
 0xf72   :  { %v439_v53 = vsel %vm350_vm12, 1.0, %v450_v41  ;;  %v445_v41 = vld [vmem:[%s723_s6] ss:$0 sm:$0xff] }
 0xf73   :  { %353 = vadd.xlane.f32.xlu0 %v439_v53 }
 0xfe6   :  { %v354_v56 = vpop.xlane.xlu0 %353 }
 0xfe7   :  { %vm355_vm13 = vcmp.ge.f32.partialorder %v354_v56, 19.0 }
 0xfe8   :  { %v356_v57 = vsel %vm355_vm13, %v349_v52, %v348_v51 }
 0xfe9   :  { %vm357_vm14 = vcmp.ge.s32.totalorder %v597_v40, %v356_v57 }
 0xfea   :  { %440 = vmatmul.msk.f32.vlgmr.msra.gmra.mxu2 %vm357_vm14, %v597_v40 }
0x106d   :  { %v396_v58 = vpop.f32.mrf.mxu2 }
0x106e   :  { %v397_v59 = vadd.f32 %v445_v41, %v396_v58 }
0x1070   :  { %v399_v60 = vsub.f32 0.0, %v397_v59 }
0x1072   :  { %v400_v61 = vmul.f32 1.442695, %v399_v60 }
0x1074   :  { %446 = vpow2.f32 %v400_v61 }
0x107a   :  { %v447_v62 = vpop.eup %446 }
0x107b   :  { %v402_v63 = vadd.f32 1.0, %v447_v62 }
0x107d   :  { %448 = vrcp.f32 %v402_v63 }
0x1083   :  { %v449_v0 = vpop.eup %448 }
0x1084   :  { %404 = vst [vmem:[%s724_s7] sm:$0xff] %v449_v0 }

</bundles_post_ra>
